<compile_context>
chip_gen: v6e
topology: v6e:2x2x1
jax: 0.10.0
libtpu: 0.0.40
codegen_flags: <defaults>
</compile_context>

<pallas_src>
import jax
import jax.numpy as jnp
from jax.experimental import pallas as pl
from jax.experimental.pallas import tpu as pltpu


def _round_up(x, m):
    return (x + m - 1) // m * m


def soft_embedding_kernel(x_ref, pw_ref, pb_ref, emb_ref, o_ref):
    # x_ref:   (tm, 1)      f32       scalar feature per row
    # pw_ref:  (1, N_pad)   f32       projection weight (padded cols = 0)
    # pb_ref:  (1, N_pad)   f32       projection bias   (padded cols = -1e30)
    # emb_ref: (N_pad, D)   bf16/f32  embedding table   (padded rows = 0)
    # o_ref:   (tm, D)      bf16/f32  soft one-hot embedding output
    x = x_ref[...]                                      # (tm, 1)
    logits = x * pw_ref[...] + pb_ref[...]              # (tm, N_pad), f32

    # Numerically-stable softmax numerator, kept in f32 (v5e has no bf16
    # VPU/EUP).  Padded columns give exp(-1e30 - m) == 0 exactly.
    m = jnp.max(logits, axis=-1, keepdims=True)
    e = jnp.exp(logits - m)                             # (tm, N_pad), f32
    denom = jnp.sum(e, axis=-1, keepdims=True)          # (tm, 1), f32

    # Un-normalized numerator @ table on the MXU with f32 accumulation.
    acc = jnp.dot(e.astype(emb_ref.dtype), emb_ref[...],
                  preferred_element_type=jnp.float32)   # (tm, D), f32

    # Normalize AFTER the matmul with an exact f32 divide on the tiny
    # (tm, 1) denominator: negligible cost, removes the approx-reciprocal
    # error from the result path, and keeps each row an exact convex
    # combination of embeddings.
    o_ref[...] = (acc * (1.0 / denom)).astype(o_ref.dtype)


def soft_embedding(x, proj_w, proj_b, emb_table, *,
                   tm=2048,
                   table_dtype=jnp.bfloat16,
                   out_dtype=jnp.bfloat16,
                   pad_embedding_dim=False,
                   vmem_limit_bytes=None):
    """x: (B, S) float -> (B, S, D) in `out_dtype`.

    tm:                requested row tile of the flattened (B*S) input.
    table_dtype:       dtype of the table / MXU operands (bf16 default).
    out_dtype:         output dtype (bf16 default: kernel is write-bound).
    pad_embedding_dim: lane-pad D to a multiple of 128 (lane-dense stores at
                       the cost of up to 4x write traffic for small D).
    """
    B, S = x.shape
    N, D = emb_table.shape
    M = B * S

    out_bytes = jnp.dtype(out_dtype).itemsize
    emb_bytes = jnp.dtype(table_dtype).itemsize

    # Sublane granule of the output dtype (f32 -> 8 rows, bf16 -> 16).
    granule = max(8, 32 // out_bytes)

    N_pad = _round_up(N, 128)
    D_out = _round_up(D, 128) if pad_embedding_dim else D

    # ---- row-tile selection -------------------------------------------
    # Per-row VMEM working set: double-buffered output + x blocks plus a
    # generous estimate of the f32 softmax intermediates (logits, exp, ...).
    bytes_per_row = 2 * D_out * out_bytes + 2 * 4 + 4 * N_pad * 4
    row_budget = 24 * 1024 * 1024                       # fits v7x 64 MiB/core
    tm_cap = max(granule, (row_budget // bytes_per_row) // granule * granule)
    tm_eff = max(granule, min(tm // granule * granule, tm_cap))
    # Keep >= 2 grid steps once there is enough work (2 TensorCores on v7x).
    if M > granule:
        tm_eff = min(tm_eff, _round_up(pl.cdiv(M, 2), granule))
    tm_eff = min(tm_eff, _round_up(M, granule))
    M_pad = _round_up(M, tm_eff)
    grid = M_pad // tm_eff

    # ---- explicit VMEM budget (v5e default scoped is only 16 MiB) ------
    if vmem_limit_bytes is None:
        need = (tm_eff * bytes_per_row
                + 2 * 2 * N_pad * 4                     # proj_w / proj_b
                + 2 * N_pad * D_out * emb_bytes)        # table (<= 2 buffers)
        vmem_limit_bytes = int(min(64 * 1024 * 1024,
                                   max(32 * 1024 * 1024, 2 * need)))

    cost = pl.CostEstimate(
        flops=2 * M_pad * N_pad * D_out,
        transcendentals=M_pad * N_pad,
        bytes_accessed=(M_pad * 4 + 2 * N_pad * 4
                        + N_pad * D_out * emb_bytes
                        + M_pad * D_out * out_bytes),
    )

    # ---- pad operands (wrapper-side, plain JAX) -------------------------
    x_flat = jnp.zeros((M_pad, 1), jnp.float32)
    x_flat = x_flat.at[:M, 0].set(x.reshape(M).astype(jnp.float32))
    pw = jnp.zeros((1, N_pad), jnp.float32)
    pw = pw.at[0, :N].set(proj_w.reshape(N).astype(jnp.float32))
    # Padded logit columns get a huge negative bias -> softmax weight == 0.
    pb = jnp.full((1, N_pad), -1e30, dtype=jnp.float32)
    pb = pb.at[0, :N].set(proj_b.reshape(N).astype(jnp.float32))
    emb = jnp.zeros((N_pad, D_out), table_dtype)
    emb = emb.at[:N, :D].set(emb_table.astype(table_dtype))

    def _call(single_buffer_consts):
        const_kw = {}
        if single_buffer_consts:
            # Grid-invariant operands: one VMEM buffer instead of two.
            const_kw = dict(pipeline_mode=pl.Buffered(1))
        in_specs = [
            pl.BlockSpec((tm_eff, 1), lambda i: (i, 0)),            # x rows
            pl.BlockSpec((1, N_pad), lambda i: (0, 0), **const_kw),  # proj w
            pl.BlockSpec((1, N_pad), lambda i: (0, 0), **const_kw),  # proj b
            pl.BlockSpec((N_pad, D_out), lambda i: (0, 0), **const_kw),  # E
        ]
        out_spec = pl.BlockSpec((tm_eff, D_out), lambda i: (i, 0))
        return pl.pallas_call(
            soft_embedding_kernel,
            out_shape=jax.ShapeDtypeStruct((M_pad, D_out), out_dtype),
            grid_spec=pltpu.PrefetchScalarGridSpec(
                num_scalar_prefetch=0,
                grid=(grid,),
                in_specs=in_specs,
                out_specs=out_spec,
            ),
            compiler_params=pltpu.CompilerParams(
                dimension_semantics=("parallel",),
                vmem_limit_bytes=vmem_limit_bytes,
            ),
            cost_estimate=cost,
        )(x_flat, pw, pb, emb)

    try:
        out = _call(True)
    except Exception:
        # Fallback for JAX versions where BlockSpec.pipeline_mode /
        # Buffered(1) is unavailable; identical math, default buffering.
        out = _call(False)

    # Strip row / lane padding and restore (B, S, D).
    return out[:M, :D].reshape(B, S, D)


if __name__ == "__main__":
    # Small shapes consistent with the module's forward:
    B, S = 2, 8              # batch, sequence of continuous features
    N, D = 16, 32            # num_embeddings, embeddings_dim

    key = jax.random.PRNGKey(0)
    k_x, k_emb, k_w, k_b = jax.random.split(key, 4)

    # Deterministic synthetic parameters (mimicking nn.Embedding / nn.Linear init).
    x = jax.random.normal(k_x, (B, S), dtype=jnp.float32)
    emb_table = jax.random.normal(k_emb, (N, D), dtype=jnp.float32)
    bound = 1.0  # Linear(1, N): fan_in=1 -> U(-1, 1)
    proj_w = jax.random.uniform(k_w, (N,), minval=-bound, maxval=bound,
                                dtype=jnp.float32)
    proj_b = jax.random.uniform(k_b, (N,), minval=-bound, maxval=bound,
                                dtype=jnp.float32)

    # Reference forward in accurate f32 (force highest matmul precision so
    # the reference itself is not bf16-rounded by the TPU MXU default).
    logits_ref = x[..., None] * proj_w + proj_b                  # (B, S, N)
    w_ref = jax.nn.softmax(logits_ref, axis=-1)
    y_ref = jnp.einsum("bsn,nd->bsd", w_ref, emb_table,
                       precision=jax.lax.Precision.HIGHEST)

    # (1) f32-table / f32-output path.  Tolerance covers the TPU MXU's
    # default (bf16-rounded) f32 matmul precision under either execution mode.
    y32 = soft_embedding(x, proj_w, proj_b, emb_table,
                         table_dtype=jnp.float32, out_dtype=jnp.float32)
    y32 = jax.block_until_ready(y32)
    assert y32.shape == (B, S, D)
    assert jnp.allclose(y32, y_ref, atol=4e-2, rtol=4e-2), (
        "f32 path max abs err %.3e" % float(jnp.max(jnp.abs(y32 - y_ref))))

    # (2) Default performance path: bf16 table operands, bf16 output.
    y = soft_embedding(x, proj_w, proj_b, emb_table)
    y = jax.block_until_ready(y)
    assert y.shape == (B, S, D)
    y_f32 = y.astype(jnp.float32)
    assert jnp.allclose(y_f32, y_ref, atol=6e-2, rtol=6e-2), (
        "bf16 path max abs err %.3e" % float(jnp.max(jnp.abs(y_f32 - y_ref))))

    print("KERNEL_OK")
</pallas_src>

<mosaic_0001>
module attributes {stable_mosaic.version = 11 : i64} {
  func.func @soft_embedding_kernel(%arg0: i32, %arg1: memref<8x1xf32, #tpu.memory_space<vmem>>, %arg2: memref<1x128xf32, #tpu.memory_space<vmem>>, %arg3: memref<1x128xf32, #tpu.memory_space<vmem>>, %arg4: memref<128x32xf32, #tpu.memory_space<vmem>>, %arg5: memref<8x32xf32, #tpu.memory_space<vmem>>) attributes {dimension_semantics = [#tpu.dimension_semantics<parallel>], iteration_bounds = array<i64: 2>, scalar_prefetch = 0 : i64, scratch_operands = 0 : i64, tpu.core_type = #tpu.core_type<tc>, window_params = [{transform_indices = @transform_0, window_bounds = array<i64: 8, 1>}, {pipeline_mode = #tpu.pipeline_mode<synchronous>, transform_indices = @transform_1, window_bounds = array<i64: 1, 128>}, {pipeline_mode = #tpu.pipeline_mode<synchronous>, transform_indices = @transform_2, window_bounds = array<i64: 1, 128>}, {pipeline_mode = #tpu.pipeline_mode<synchronous>, transform_indices = @transform_3, window_bounds = array<i64: 128, 32>}, {transform_indices = @transform_4, window_bounds = array<i64: 8, 32>}]} {
    %c0 = arith.constant 0 : index
    %c0_0 = arith.constant 0 : index
    %0 = vector.load %arg1[%c0, %c0_0] : memref<8x1xf32, #tpu.memory_space<vmem>>, vector<8x1xf32>
    %c0_1 = arith.constant 0 : index
    %c0_2 = arith.constant 0 : index
    %1 = vector.load %arg2[%c0_1, %c0_2] : memref<1x128xf32, #tpu.memory_space<vmem>>, vector<1x128xf32>
    %2 = vector.broadcast %0 : vector<8x1xf32> to vector<8x128xf32>
    %3 = vector.broadcast %1 : vector<1x128xf32> to vector<8x128xf32>
    %4 = arith.mulf %2, %3 : vector<8x128xf32>
    %c0_3 = arith.constant 0 : index
    %c0_4 = arith.constant 0 : index
    %5 = vector.load %arg3[%c0_3, %c0_4] : memref<1x128xf32, #tpu.memory_space<vmem>>, vector<1x128xf32>
    %6 = vector.broadcast %5 : vector<1x128xf32> to vector<8x128xf32>
    %7 = arith.addf %4, %6 : vector<8x128xf32>
    %cst = arith.constant dense<0xFF800000> : vector<8xf32>
    %8 = vector.multi_reduction <maximumf>, %7, %cst [1] : vector<8x128xf32> to vector<8xf32>
    %9 = vector.shape_cast %8 : vector<8xf32> to vector<8x1xf32>
    %10 = vector.broadcast %9 : vector<8x1xf32> to vector<8x128xf32>
    %11 = arith.subf %7, %10 : vector<8x128xf32>
    %12 = math.exp %11 : vector<8x128xf32>
    %cst_5 = arith.constant dense<0.000000e+00> : vector<8xf32>
    %13 = vector.multi_reduction <add>, %12, %cst_5 [1] : vector<8x128xf32> to vector<8xf32>
    %14 = vector.shape_cast %13 : vector<8xf32> to vector<8x1xf32>
    %c0_6 = arith.constant 0 : index
    %c0_7 = arith.constant 0 : index
    %15 = vector.load %arg4[%c0_6, %c0_7] : memref<128x32xf32, #tpu.memory_space<vmem>>, vector<128x32xf32>
    %cst_8 = arith.constant dense<0.000000e+00> : vector<8x32xf32>
    %16 = tpu.matmul %12, %15, %cst_8 {dimension_numbers = #tpu.dot_dimension_numbers<[1], [0], [0], [1], [0, 0, 1, 1], [], []>} : vector<8x128xf32>, vector<128x32xf32>, vector<8x32xf32> -> vector<8x32xf32>
    %cst_9 = arith.constant 1.000000e+00 : f32
    %17 = vector.broadcast %cst_9 : f32 to vector<8x1xf32>
    %18 = arith.divf %17, %14 : vector<8x1xf32>
    %19 = vector.broadcast %18 : vector<8x1xf32> to vector<8x32xf32>
    %20 = arith.mulf %16, %19 : vector<8x32xf32>
    %c0_10 = arith.constant 0 : index
    %c0_11 = arith.constant 0 : index
    %21 = vector.load %arg5[%c0_10, %c0_11] : memref<8x32xf32, #tpu.memory_space<vmem>>, vector<8x32xf32>
    tpu.vector_store %arg5[%c0_10, %c0_11], %20 {strides = array<i32>} : memref<8x32xf32, #tpu.memory_space<vmem>>, vector<8x32xf32>,
    return
  }
  func.func @transform_0(%arg0: i32) -> (i32, i32) {
    %c0_i32 = arith.constant 0 : i32
    %c0_i32_0 = arith.constant 0 : i32
    return %arg0, %c0_i32 : i32, i32
  }
  func.func @transform_1(%arg0: i32) -> (i32, i32) {
    %c0_i32 = arith.constant 0 : i32
    %c0_i32_0 = arith.constant 0 : i32
    %c0_i32_1 = arith.constant 0 : i32
    return %c0_i32, %c0_i32_0 : i32, i32
  }
  func.func @transform_2(%arg0: i32) -> (i32, i32) {
    %c0_i32 = arith.constant 0 : i32
    %c0_i32_0 = arith.constant 0 : i32
    %c0_i32_1 = arith.constant 0 : i32
    return %c0_i32, %c0_i32_0 : i32, i32
  }
  func.func @transform_3(%arg0: i32) -> (i32, i32) {
    %c0_i32 = arith.constant 0 : i32
    %c0_i32_0 = arith.constant 0 : i32
    %c0_i32_1 = arith.constant 0 : i32
    return %c0_i32, %c0_i32_0 : i32, i32
  }
  func.func @transform_4(%arg0: i32) -> (i32, i32) {
    %c0_i32 = arith.constant 0 : i32
    %c0_i32_0 = arith.constant 0 : i32
    return %arg0, %c0_i32 : i32, i32
  }
}

module attributes {stable_mosaic.version = 11 : i64} {
  func.func @soft_embedding_kernel(%arg0: i32, %arg1: memref<8x1xf32, #tpu.memory_space<vmem>>, %arg2: memref<1x128xf32, #tpu.memory_space<vmem>>, %arg3: memref<1x128xf32, #tpu.memory_space<vmem>>, %arg4: memref<128x32xf32, #tpu.memory_space<vmem>>, %arg5: memref<8x32xf32, #tpu.memory_space<vmem>>) attributes {dimension_semantics = [#tpu.dimension_semantics<parallel>], iteration_bounds = array<i64: 2>, scalar_prefetch = 0 : i64, scratch_operands = 0 : i64, tpu.core_type = #tpu.core_type<tc>, window_params = [{transform_indices = @transform_0, window_bounds = array<i64: 8, 1>}, {pipeline_mode = #tpu.pipeline_mode<synchronous>, transform_indices = @transform_1, window_bounds = array<i64: 1, 128>}, {pipeline_mode = #tpu.pipeline_mode<synchronous>, transform_indices = @transform_2, window_bounds = array<i64: 1, 128>}, {pipeline_mode = #tpu.pipeline_mode<synchronous>, transform_indices = @transform_3, window_bounds = array<i64: 128, 32>}, {transform_indices = @transform_4, window_bounds = array<i64: 8, 32>}]} {
    %c0 = arith.constant 0 : index
    %c0_0 = arith.constant 0 : index
    %0 = vector.load %arg1[%c0, %c0_0] : memref<8x1xf32, #tpu.memory_space<vmem>>, vector<8x1xf32>
    %c0_1 = arith.constant 0 : index
    %c0_2 = arith.constant 0 : index
    %1 = vector.load %arg2[%c0_1, %c0_2] : memref<1x128xf32, #tpu.memory_space<vmem>>, vector<1x128xf32>
    %2 = vector.broadcast %0 : vector<8x1xf32> to vector<8x128xf32>
    %3 = vector.broadcast %1 : vector<1x128xf32> to vector<8x128xf32>
    %4 = arith.mulf %2, %3 : vector<8x128xf32>
    %c0_3 = arith.constant 0 : index
    %c0_4 = arith.constant 0 : index
    %5 = vector.load %arg3[%c0_3, %c0_4] : memref<1x128xf32, #tpu.memory_space<vmem>>, vector<1x128xf32>
    %6 = vector.broadcast %5 : vector<1x128xf32> to vector<8x128xf32>
    %7 = arith.addf %4, %6 : vector<8x128xf32>
    %cst = arith.constant dense<0xFF800000> : vector<8xf32>
    %8 = vector.multi_reduction <maximumf>, %7, %cst [1] : vector<8x128xf32> to vector<8xf32>
    %9 = vector.shape_cast %8 : vector<8xf32> to vector<8x1xf32>
    %10 = vector.broadcast %9 : vector<8x1xf32> to vector<8x128xf32>
    %11 = arith.subf %7, %10 : vector<8x128xf32>
    %12 = math.exp %11 : vector<8x128xf32>
    %cst_5 = arith.constant dense<0.000000e+00> : vector<8xf32>
    %13 = vector.multi_reduction <add>, %12, %cst_5 [1] : vector<8x128xf32> to vector<8xf32>
    %14 = vector.shape_cast %13 : vector<8xf32> to vector<8x1xf32>
    %c0_6 = arith.constant 0 : index
    %c0_7 = arith.constant 0 : index
    %15 = vector.load %arg4[%c0_6, %c0_7] : memref<128x32xf32, #tpu.memory_space<vmem>>, vector<128x32xf32>
    %cst_8 = arith.constant dense<0.000000e+00> : vector<8x32xf32>
    %16 = tpu.matmul %12, %15, %cst_8 {dimension_numbers = #tpu.dot_dimension_numbers<[1], [0], [0], [1], [0, 0, 1, 1], [], []>} : vector<8x128xf32>, vector<128x32xf32>, vector<8x32xf32> -> vector<8x32xf32>
    %cst_9 = arith.constant 1.000000e+00 : f32
    %17 = vector.broadcast %cst_9 : f32 to vector<8x1xf32>
    %18 = arith.divf %17, %14 : vector<8x1xf32>
    %19 = vector.broadcast %18 : vector<8x1xf32> to vector<8x32xf32>
    %20 = arith.mulf %16, %19 : vector<8x32xf32>
    %c0_10 = arith.constant 0 : index
    %c0_11 = arith.constant 0 : index
    %21 = vector.load %arg5[%c0_10, %c0_11] : memref<8x32xf32, #tpu.memory_space<vmem>>, vector<8x32xf32>
    tpu.vector_store %arg5[%c0_10, %c0_11], %20 {strides = array<i32>} : memref<8x32xf32, #tpu.memory_space<vmem>>, vector<8x32xf32>,
    return
  }
  func.func @transform_0(%arg0: i32) -> (i32, i32) {
    %c0_i32 = arith.constant 0 : i32
    %c0_i32_0 = arith.constant 0 : i32
    return %arg0, %c0_i32 : i32, i32
  }
  func.func @transform_1(%arg0: i32) -> (i32, i32) {
    %c0_i32 = arith.constant 0 : i32
    %c0_i32_0 = arith.constant 0 : i32
    %c0_i32_1 = arith.constant 0 : i32
    return %c0_i32, %c0_i32_0 : i32, i32
  }
  func.func @transform_2(%arg0: i32) -> (i32, i32) {
    %c0_i32 = arith.constant 0 : i32
    %c0_i32_0 = arith.constant 0 : i32
    %c0_i32_1 = arith.constant 0 : i32
    return %c0_i32, %c0_i32_0 : i32, i32
  }
  func.func @transform_3(%arg0: i32) -> (i32, i32) {
    %c0_i32 = arith.constant 0 : i32
    %c0_i32_0 = arith.constant 0 : i32
    %c0_i32_1 = arith.constant 0 : i32
    return %c0_i32, %c0_i32_0 : i32, i32
  }
  func.func @transform_4(%arg0: i32) -> (i32, i32) {
    %c0_i32 = arith.constant 0 : i32
    %c0_i32_0 = arith.constant 0 : i32
    return %arg0, %c0_i32 : i32, i32
  }
}

</mosaic_0001>

<bundles_post_ra>
// kernel: tpu_custom_call.1
= control target key start
LH: loop header
LB: loop body
LE: loop exit
PB: predicated region body
PF: predicated region fallthrough
CT: control target
= control target key end

     0   :  { %9 = vsyncpa [#allocation3], 0  ;;  %s735_s0 = inlined_call_operand.vmem [shape: f32[16,1], index: 0, kind: input, shape index: {}]   ;;  %s736_s1 = inlined_call_operand.vmem [shape: f32[1,128], index: 1, kind: input, shape index: {}]   ;;  %s737_s2 = inlined_call_operand.vmem [shape: f32[1,128], index: 2, kind: input, shape index: {}]   ;;  %s738_s3 = inlined_call_operand.vmem [shape: f32[128,32], index: 3, kind: input, shape index: {}]   ;;  %s739_s4 = inlined_call_operand.hbm [shape: f32[16,32], index: 4, kind: output, shape index: {}]  }
   0x1   :  { %11 = vsyncpa [#allocation3 + $0x1], 0  ;;  %s588_s15 = smov 0   ;;  %s590_s16 = smov 0  }
   0x2   :  { %s592_s17 = smov 0   ;;  %s594_s18 = smov 0  }
   0x3 LB: > { %s609_s19 = sadd.s32 4294967295, %s557_s18   ;;  %s386_s20 = sadd.s32 4294967294, %s557_s18   ;;  %s557_s18 = sphi %s594_s18, %s745_s18   ;;  %s553_s17 = sphi %s592_s17, %s744_s17   ;;  %s549_s16 = sphi %s590_s16, %s743_s16   ;;  %s545_s15 = sphi %s588_s15, %s742_s15  }
   0x4   : > { %s613_s21 = sadd.s32 1, %s557_s18   ;;  %s113_s22 = sadd.s32 1, %s553_s17 }
   0x5   : > { %s110_s23 = ssub.s32 %s557_s18, %s613_s21  ;;  %p123_p0 = scmp.ne.s32.totalorder %s553_s17, %s549_s16 }
   0x6   : > { %p111_p1 = scmp.eq.s32.totalorder %s110_s23, 0  ;;  %p124_p2 = scmp.eq.s32.totalorder %s609_s19, 1 }
   0x7   : > { %p129_p3 = scmp.ne.s32.totalorder %s549_s16, %s545_s15  ;;  %p130_p4 = scmp.eq.s32.totalorder %s386_s20, 1 }
   0x8   : > { %s624_s24 = scalar_select %p111_p1, %s553_s17, %s113_s22  }
   0x9   : > { %p626_p5 = por %p124_p2, %p123_p0  ;;  %p630_p6 = por %p130_p4, %p129_p3 }
   0xa   : > { %p389_p7 = scmp.ge.s32.totalorder %s557_s18, 1  ;;  %p164_p8 = scmp.lt.s32.totalorder %s557_s18, 3 }
   0xc   : > { %p165_p9 = pnand %p389_p7, %p164_p8 }
   0xd   : > { %p189_p10 = scmp.lt.s32.totalorder (!%p165_p9), %s609_s19, 1  ;;  %s186_s8 = sand.u32 (!%p165_p9), 1, %s549_s16  }
   0xe   : > { %168 = sbr.rel (%p165_p9) target bundleno = 516 (0x204), region = 36  ;;  %s390_s9 = sshll.u32 (!%p165_p9), %s186_s8, 3 }
   0xf   : > { %s395_s10 = sshll.u32 (!%p165_p9), %s609_s19, 7  ;;  %s188_s11 = scalar_lea.vmem (!%p165_p9), [#allocation2], %s390_s9 }
  0x10   : > { %s327_s12 = sshll.u32 (!%p165_p9), %s188_s11, 4  ;;  %s700_s20 = scalar_lea.hbm (!%p165_p9), %s739_s4, %s395_s10  ;;  %s328_s12 = int_to_ptr.vmem [resolvable:$true] %s327_s12 }
  0x11   : > { %s314_s22 = scalar_lea.sflag (!%p165_p9), [#allocation3], %s186_s8  ;;  %s497_s23 = scalar_lea.vmem (!%p165_p9), %s328_s12, 128 }
  0x12   : > { %p498_p11 = scmp.ne.s32.totalorder (!%p165_p9), %s328_s12, %s497_s23 }
  0x13   : > { %v559_v0 = vmov 0   ;;  %s190_s27 = scalar_select %p189_p10, %s609_s19, 1  ;;  %v237_v2 = vld [vmem:[%s738_s3 + $0x78] sm:$0xff]  ;;  %v560_v3 = vmov 0.0   ;;  %v236_v4 = vld [vmem:[%s738_s3 + $0x70] sm:$0xff]  ;;  %v235_v5 = vld [vmem:[%s738_s3 + $0x68] sm:$0xff] }
  0x14   : > { %492 = vset.pattern.permute.xlu0 %v559_v0  ;;  %415 = vmatprep.subr.mxu0 %v560_v3  ;;  %v234_v6 = vld [vmem:[%s738_s3 + $0x60] sm:$0xff]  ;;  %v233_v7 = vld [vmem:[%s738_s3 + $0x58] sm:$0xff]  ;;  %v232_v8 = vld [vmem:[%s738_s3 + $0x50] sm:$0xff]  ;;  %vm561_vm0 = vmmov 0   ;;  %vm311_vm1 = vcmask 261120   ;;  %p499_p12 = pnand %p498_p11, %p626_p5  ;;  %s562_s19 = smov [#allocation2]  }
  0x15   : > { %s391_s28 = sshll.u32 %s190_s27, 3  ;;  %416 = vmatpush3.msra.mxu0 %v237_v2  ;;  %v231_v9 = vld [vmem:[%s738_s3 + $0x48] sm:$0xff]  ;;  %v392_v10 = vld [vmem:[%s736_s1] ss:$0 sm:$0xff]  ;;  %v229_v16 = vld [vmem:[%s738_s3 + $0x38] sm:$0xff]  ;;  %447 = vmatprep.mubr.msk.f32.mxu0 %vm561_vm0, %v560_v3  ;;  %s501_s27 = sshll.u32 %s562_s19, 4  ;;  %s502_s27 = int_to_ptr.vmem [resolvable:$false] %s501_s27 }
  0x16   : > { %s192_s5 = scalar_lea.vmem %s735_s0, %s391_s28  ;;  %417 = vmatprep.subr.mxu0 %v560_v3  ;;  %v393_v12 = vld [vmem:[%s737_s2] ss:$0 sm:$0xff]  ;;  %v228_v17 = vld [vmem:[%s738_s3 + $0x30] sm:$0xff]  ;;  %v227_v18 = vld [vmem:[%s738_s3 + $0x28] sm:$0xff]  ;;  %p500_p13 = pneg %p499_p12 }
  0x17   : > { %v193_v1 = vld [vmem:[%s192_s5] sm:$0xff]  ;;  %418 = vmatpush3.msra.mxu0 %v236_v4  ;;  %v225_v20 = vld [vmem:[%s738_s3 + $0x18] sm:$0xff]  ;;  %v224_v21 = vld [vmem:[%s738_s3 + $0x10] sm:$0xff]  ;;  %s503_s28 = scalar_lea.vmem %s502_s27, 256  ;;  %p504_p0 = scmp.lt.s32.totalorder %s328_s12, %s502_s27 }
  0x18   : > { %197 = vperm.xlu0 %492, %v193_v1   ;;  %419 = vmatprep.subr.mxu0 %v560_v3  ;;  %v230_v15 = vld [vmem:[%s738_s3 + $0x40] sm:$0xff]  ;;  %v223_v22 = vld [vmem:[%s738_s3 + $0x8] sm:$0xff]  ;;  %p505_p1 = scmp.lt.s32.totalorder %s503_s28, %s497_s23 }
  0x19   : > { %420 = vmatpush3.msra.mxu0 %v235_v5  ;;  %v226_v19 = vld [vmem:[%s738_s3 + $0x20] sm:$0xff] }
  0x1a   : > { %421 = vmatprep.subr.mxu0 %v560_v3  ;;  %v222_v23 = vld [vmem:[%s738_s3] sm:$0xff]  ;;  %p506_p2 = por %p505_p1, %p504_p0 }
  0x1b   : > { %422 = vmatpush3.msra.mxu0 %v234_v6 }
  0x1c   : > { %423 = vmatprep.subr.mxu0 %v560_v3  ;;  %p507_p3 = pnand %p506_p2, %p500_p13 }
  0x1d   : > { %424 = vmatpush3.msra.mxu0 %v233_v7 }
  0x1e   : > { %425 = vmatprep.subr.mxu0 %v560_v3 }
  0x1f   : > { %426 = vmatpush3.msra.mxu0 %v232_v8 }
  0x20   : > { %427 = vmatprep.subr.mxu0 %v560_v3 }
  0x21   : > { %428 = vmatpush3.msra.mxu0 %v231_v9 }
  0x22   : > { %429 = vmatprep.subr.mxu0 %v560_v3 }
  0x23   : > { %430 = vmatpush3.msra.mxu0 %v230_v15 }
  0x24   : > { %431 = vmatprep.subr.mxu0 %v560_v3 }
  0x25   : > { %432 = vmatpush3.msra.mxu0 %v229_v16 }
  0x26   : > { %433 = vmatprep.subr.mxu0 %v560_v3 }
  0x27   : > { %434 = vmatpush3.msra.mxu0 %v228_v17 }
  0x28   : > { %435 = vmatprep.subr.mxu0 %v560_v3 }
  0x29   : > { %436 = vmatpush3.msra.mxu0 %v227_v18 }
  0x2a   : > { %437 = vmatprep.subr.mxu0 %v560_v3 }
  0x2b   : > { %438 = vmatpush3.msra.mxu0 %v226_v19 }
  0x2c   : > { %439 = vmatprep.subr.mxu0 %v560_v3 }
  0x2d   : > { %440 = vmatpush3.msra.mxu0 %v225_v20 }
  0x2e   : > { %441 = vmatprep.subr.mxu0 %v560_v3 }
  0x2f   : > { %442 = vmatpush3.msra.mxu0 %v224_v21 }
  0x30   : > { %443 = vmatprep.subr.mxu0 %v560_v3 }
  0x31   : > { %444 = vmatpush3.msra.mxu0 %v223_v22 }
  0x32   : > { %445 = vmatprep.subr.mxu0 %v560_v3 }
  0x33   : > { %446 = vmatpush3.msra.mxu0 %v222_v23 }
  0x93   : > { %v198_v11 = vpop.permute.xlu0 %197 }
  0x94   : > { %v206_v13 = vmul.f32 %v392_v10, %v198_v11 }
  0x96   : > { %v214_v14 = vadd.f32 %v393_v12, %v206_v13 }
  0x98   : > { %215 = vmax.xlane.f32.xlu0 %v214_v14 }
 0x121   : > { %v216_v24 = vpop.xlane.xlu0 %215 }
 0x122   : > { %v217_v25 = vsub.f32 %v214_v14, %v216_v24 }
 0x124   : > { %v218_v26 = vmul.f32 1.442695, %v217_v25 }
 0x126   : > { %493 = vpow2.f32 %v218_v26 }
 0x133   : > { %v494_v27 = vpop.eup %493 }
 0x134   : > { %220 = vadd.xlane.f32.xlu1 %v494_v27  ;;  %448 = vmatmul.mubr.f32.vlgmr.msra.gmra.mxu0 %v494_v27 }
 0x1bd   : > { %v221_v28 = vpop.xlane.xlu1 %220 }
 0x1be   : > { %495 = vrcp.f32 %v221_v28 }
 0x1cb   : > { %v496_v29 = vpop.eup %495 }
 0x1f4   : > { %v304_v30 = vpop.f32.mrf.mxu0 }
 0x1f5   : > { %v310_v31 = vmul.f32 %v496_v29, %v304_v30 }
 0x1f6   : > { %v449_v32 = vpop.f32.mrf.mxu0 }
 0x1f7   : > { %312 = vst.msk [vmem:[%s188_s11] sm:$0xff] %vm311_vm1, %v310_v31 }
 0x1f8   : > { %510 = shalt.err (!%p507_p3)
}
 0x1f9   : > { %s511_s29 = scalar_lea.hbm %s700_s20, 128  ;;  %s515_s6 = scalar_lea.hbm %s739_s4, 256 }
 0x1fa   : > { %p512_p4 = scmp.ne.s32.totalorder %s700_s20, %s511_s29  ;;  %p516_p9 = scmp.lt.s32.totalorder %s700_s20, %s739_s4 }
 0x1fb   : > { %p517_p10 = scmp.lt.s32.totalorder %s515_s6, %s511_s29 }
 0x1fc   : > { %p513_p7 = pnand %p512_p4, %p626_p5 }
 0x1fd   : > { %p518_p11 = por %p517_p10, %p516_p9 }
 0x1fe   : > { %p514_p8 = pneg %p513_p7 }
 0x200   : > { %p519_p12 = pnand %p518_p11, %p514_p8 }
 0x202   : > { %522 = shalt.err (!%p519_p12)
}
 0x203   : > { %450 = dma.vmem_to_hbm [thread:$0]  (%p626_p5), %s328_s12, 128, %s700_s20, %s314_s22  }
 0x204 PF: > { %p456_p13 = scmp.ge.s32.totalorder %s557_s18, 2  ;;  %s339_s9 = sand.u32 1, %s545_s15  }
 0x205   : > { %s340_s10 = scalar_lea.sflag [#allocation3], %s339_s9 }
 0x206   : > { %p453_p0 = pnand %p456_p13, %p630_p6 }
 0x208   : > { %p454_p1 = pneg %p453_p0 }
 0x20a   : > { %540 = dma.done.wait (%p454_p1), %s340_s10, 128  }
 0x20b   : > { %542 = vsyncadd (%p454_p1), %s340_s10, 4294967168  ;;  %p14_p2 = scmp.ge.s32.totalorder %s613_s21, 4   ;;  %s742_s15 = smov %s549_s16 }
 0x20c   : > { %s743_s16 = smov %s553_s17  ;;  %s744_s17 = smov %s624_s24 }
 0x20d   : > { %s745_s18 = smov %s613_s21  ;;  %16 = sbr.rel (!%p14_p2) target bundleno = 3 (0x3), region = 71 }
 0x212   :  { %345 = vsyncpa [#allocation3], 1 }
 0x213   :  { %347 = vsyncpa [#allocation3 + $0x1], 1 }

// kernel: tpu_custom_call.1
= control target key start
LH: loop header
LB: loop body
LE: loop exit
PB: predicated region body
PF: predicated region fallthrough
CT: control target
= control target key end

     0   :  { %9 = vsyncpa [#allocation3], 0  ;;  %s735_s0 = inlined_call_operand.vmem [shape: f32[16,1], index: 0, kind: input, shape index: {}]   ;;  %s736_s1 = inlined_call_operand.vmem [shape: f32[1,128], index: 1, kind: input, shape index: {}]   ;;  %s737_s2 = inlined_call_operand.vmem [shape: f32[1,128], index: 2, kind: input, shape index: {}]   ;;  %s738_s3 = inlined_call_operand.vmem [shape: f32[128,32], index: 3, kind: input, shape index: {}]   ;;  %s739_s4 = inlined_call_operand.hbm [shape: f32[16,32], index: 4, kind: output, shape index: {}]  }
   0x1   :  { %11 = vsyncpa [#allocation3 + $0x1], 0  ;;  %s588_s15 = smov 0   ;;  %s590_s16 = smov 0  }
   0x2   :  { %s592_s17 = smov 0   ;;  %s594_s18 = smov 0  }
   0x3 LB: > { %s609_s19 = sadd.s32 4294967295, %s557_s18   ;;  %s386_s20 = sadd.s32 4294967294, %s557_s18   ;;  %s557_s18 = sphi %s594_s18, %s745_s18   ;;  %s553_s17 = sphi %s592_s17, %s744_s17   ;;  %s549_s16 = sphi %s590_s16, %s743_s16   ;;  %s545_s15 = sphi %s588_s15, %s742_s15  }
   0x4   : > { %s613_s21 = sadd.s32 1, %s557_s18   ;;  %s113_s22 = sadd.s32 1, %s553_s17 }
   0x5   : > { %s110_s23 = ssub.s32 %s557_s18, %s613_s21  ;;  %p123_p0 = scmp.ne.s32.totalorder %s553_s17, %s549_s16 }
   0x6   : > { %p111_p1 = scmp.eq.s32.totalorder %s110_s23, 0  ;;  %p124_p2 = scmp.eq.s32.totalorder %s609_s19, 1 }
   0x7   : > { %p129_p3 = scmp.ne.s32.totalorder %s549_s16, %s545_s15  ;;  %p130_p4 = scmp.eq.s32.totalorder %s386_s20, 1 }
   0x8   : > { %s624_s24 = scalar_select %p111_p1, %s553_s17, %s113_s22  }
   0x9   : > { %p626_p5 = por %p124_p2, %p123_p0  ;;  %p630_p6 = por %p130_p4, %p129_p3 }
   0xa   : > { %p389_p7 = scmp.ge.s32.totalorder %s557_s18, 1  ;;  %p164_p8 = scmp.lt.s32.totalorder %s557_s18, 3 }
   0xc   : > { %p165_p9 = pnand %p389_p7, %p164_p8 }
   0xd   : > { %p189_p10 = scmp.lt.s32.totalorder (!%p165_p9), %s609_s19, 1  ;;  %s186_s8 = sand.u32 (!%p165_p9), 1, %s549_s16  }
   0xe   : > { %168 = sbr.rel (%p165_p9) target bundleno = 516 (0x204), region = 36  ;;  %s390_s9 = sshll.u32 (!%p165_p9), %s186_s8, 3 }
   0xf   : > { %s395_s10 = sshll.u32 (!%p165_p9), %s609_s19, 7  ;;  %s188_s11 = scalar_lea.vmem (!%p165_p9), [#allocation2], %s390_s9 }
  0x10   : > { %s327_s12 = sshll.u32 (!%p165_p9), %s188_s11, 4  ;;  %s700_s20 = scalar_lea.hbm (!%p165_p9), %s739_s4, %s395_s10  ;;  %s328_s12 = int_to_ptr.vmem [resolvable:$true] %s327_s12 }
  0x11   : > { %s314_s22 = scalar_lea.sflag (!%p165_p9), [#allocation3], %s186_s8  ;;  %s497_s23 = scalar_lea.vmem (!%p165_p9), %s328_s12, 128 }
  0x12   : > { %p498_p11 = scmp.ne.s32.totalorder (!%p165_p9), %s328_s12, %s497_s23 }
  0x13   : > { %v559_v0 = vmov 0   ;;  %s190_s27 = scalar_select %p189_p10, %s609_s19, 1  ;;  %v237_v2 = vld [vmem:[%s738_s3 + $0x78] sm:$0xff]  ;;  %v560_v3 = vmov 0.0   ;;  %v236_v4 = vld [vmem:[%s738_s3 + $0x70] sm:$0xff]  ;;  %v235_v5 = vld [vmem:[%s738_s3 + $0x68] sm:$0xff] }
  0x14   : > { %492 = vset.pattern.permute.xlu0 %v559_v0  ;;  %415 = vmatprep.subr.mxu0 %v560_v3  ;;  %v234_v6 = vld [vmem:[%s738_s3 + $0x60] sm:$0xff]  ;;  %v233_v7 = vld [vmem:[%s738_s3 + $0x58] sm:$0xff]  ;;  %v232_v8 = vld [vmem:[%s738_s3 + $0x50] sm:$0xff]  ;;  %vm561_vm0 = vmmov 0   ;;  %vm311_vm1 = vcmask 261120   ;;  %p499_p12 = pnand %p498_p11, %p626_p5  ;;  %s562_s19 = smov [#allocation2]  }
  0x15   : > { %s391_s28 = sshll.u32 %s190_s27, 3  ;;  %416 = vmatpush3.msra.mxu0 %v237_v2  ;;  %v231_v9 = vld [vmem:[%s738_s3 + $0x48] sm:$0xff]  ;;  %v392_v10 = vld [vmem:[%s736_s1] ss:$0 sm:$0xff]  ;;  %v229_v16 = vld [vmem:[%s738_s3 + $0x38] sm:$0xff]  ;;  %447 = vmatprep.mubr.msk.f32.mxu0 %vm561_vm0, %v560_v3  ;;  %s501_s27 = sshll.u32 %s562_s19, 4  ;;  %s502_s27 = int_to_ptr.vmem [resolvable:$false] %s501_s27 }
  0x16   : > { %s192_s5 = scalar_lea.vmem %s735_s0, %s391_s28  ;;  %417 = vmatprep.subr.mxu0 %v560_v3  ;;  %v393_v12 = vld [vmem:[%s737_s2] ss:$0 sm:$0xff]  ;;  %v228_v17 = vld [vmem:[%s738_s3 + $0x30] sm:$0xff]  ;;  %v227_v18 = vld [vmem:[%s738_s3 + $0x28] sm:$0xff]  ;;  %p500_p13 = pneg %p499_p12 }
  0x17   : > { %v193_v1 = vld [vmem:[%s192_s5] sm:$0xff]  ;;  %418 = vmatpush3.msra.mxu0 %v236_v4  ;;  %v225_v20 = vld [vmem:[%s738_s3 + $0x18] sm:$0xff]  ;;  %v224_v21 = vld [vmem:[%s738_s3 + $0x10] sm:$0xff]  ;;  %s503_s28 = scalar_lea.vmem %s502_s27, 256  ;;  %p504_p0 = scmp.lt.s32.totalorder %s328_s12, %s502_s27 }
  0x18   : > { %197 = vperm.xlu0 %492, %v193_v1   ;;  %419 = vmatprep.subr.mxu0 %v560_v3  ;;  %v230_v15 = vld [vmem:[%s738_s3 + $0x40] sm:$0xff]  ;;  %v223_v22 = vld [vmem:[%s738_s3 + $0x8] sm:$0xff]  ;;  %p505_p1 = scmp.lt.s32.totalorder %s503_s28, %s497_s23 }
  0x19   : > { %420 = vmatpush3.msra.mxu0 %v235_v5  ;;  %v226_v19 = vld [vmem:[%s738_s3 + $0x20] sm:$0xff] }
  0x1a   : > { %421 = vmatprep.subr.mxu0 %v560_v3  ;;  %v222_v23 = vld [vmem:[%s738_s3] sm:$0xff]  ;;  %p506_p2 = por %p505_p1, %p504_p0 }
  0x1b   : > { %422 = vmatpush3.msra.mxu0 %v234_v6 }
  0x1c   : > { %423 = vmatprep.subr.mxu0 %v560_v3  ;;  %p507_p3 = pnand %p506_p2, %p500_p13 }
  0x1d   : > { %424 = vmatpush3.msra.mxu0 %v233_v7 }
  0x1e   : > { %425 = vmatprep.subr.mxu0 %v560_v3 }
  0x1f   : > { %426 = vmatpush3.msra.mxu0 %v232_v8 }
  0x20   : > { %427 = vmatprep.subr.mxu0 %v560_v3 }
  0x21   : > { %428 = vmatpush3.msra.mxu0 %v231_v9 }
  0x22   : > { %429 = vmatprep.subr.mxu0 %v560_v3 }
  0x23   : > { %430 = vmatpush3.msra.mxu0 %v230_v15 }
  0x24   : > { %431 = vmatprep.subr.mxu0 %v560_v3 }
  0x25   : > { %432 = vmatpush3.msra.mxu0 %v229_v16 }
  0x26   : > { %433 = vmatprep.subr.mxu0 %v560_v3 }
  0x27   : > { %434 = vmatpush3.msra.mxu0 %v228_v17 }
  0x28   : > { %435 = vmatprep.subr.mxu0 %v560_v3 }
  0x29   : > { %436 = vmatpush3.msra.mxu0 %v227_v18 }
  0x2a   : > { %437 = vmatprep.subr.mxu0 %v560_v3 }
  0x2b   : > { %438 = vmatpush3.msra.mxu0 %v226_v19 }
  0x2c   : > { %439 = vmatprep.subr.mxu0 %v560_v3 }
  0x2d   : > { %440 = vmatpush3.msra.mxu0 %v225_v20 }
  0x2e   : > { %441 = vmatprep.subr.mxu0 %v560_v3 }
  0x2f   : > { %442 = vmatpush3.msra.mxu0 %v224_v21 }
  0x30   : > { %443 = vmatprep.subr.mxu0 %v560_v3 }
  0x31   : > { %444 = vmatpush3.msra.mxu0 %v223_v22 }
  0x32   : > { %445 = vmatprep.subr.mxu0 %v560_v3 }
  0x33   : > { %446 = vmatpush3.msra.mxu0 %v222_v23 }
  0x93   : > { %v198_v11 = vpop.permute.xlu0 %197 }
  0x94   : > { %v206_v13 = vmul.f32 %v392_v10, %v198_v11 }
  0x96   : > { %v214_v14 = vadd.f32 %v393_v12, %v206_v13 }
  0x98   : > { %215 = vmax.xlane.f32.xlu0 %v214_v14 }
 0x121   : > { %v216_v24 = vpop.xlane.xlu0 %215 }
 0x122   : > { %v217_v25 = vsub.f32 %v214_v14, %v216_v24 }
 0x124   : > { %v218_v26 = vmul.f32 1.442695, %v217_v25 }
 0x126   : > { %493 = vpow2.f32 %v218_v26 }
 0x133   : > { %v494_v27 = vpop.eup %493 }
 0x134   : > { %220 = vadd.xlane.f32.xlu1 %v494_v27  ;;  %448 = vmatmul.mubr.f32.vlgmr.msra.gmra.mxu0 %v494_v27 }
 0x1bd   : > { %v221_v28 = vpop.xlane.xlu1 %220 }
 0x1be   : > { %495 = vrcp.f32 %v221_v28 }
 0x1cb   : > { %v496_v29 = vpop.eup %495 }
 0x1f4   : > { %v304_v30 = vpop.f32.mrf.mxu0 }
 0x1f5   : > { %v310_v31 = vmul.f32 %v496_v29, %v304_v30 }
 0x1f6   : > { %v449_v32 = vpop.f32.mrf.mxu0 }
 0x1f7   : > { %312 = vst.msk [vmem:[%s188_s11] sm:$0xff] %vm311_vm1, %v310_v31 }
 0x1f8   : > { %510 = shalt.err (!%p507_p3)
}
 0x1f9   : > { %s511_s29 = scalar_lea.hbm %s700_s20, 128  ;;  %s515_s6 = scalar_lea.hbm %s739_s4, 256 }
 0x1fa   : > { %p512_p4 = scmp.ne.s32.totalorder %s700_s20, %s511_s29  ;;  %p516_p9 = scmp.lt.s32.totalorder %s700_s20, %s739_s4 }
 0x1fb   : > { %p517_p10 = scmp.lt.s32.totalorder %s515_s6, %s511_s29 }
 0x1fc   : > { %p513_p7 = pnand %p512_p4, %p626_p5 }
 0x1fd   : > { %p518_p11 = por %p517_p10, %p516_p9 }
 0x1fe   : > { %p514_p8 = pneg %p513_p7 }
 0x200   : > { %p519_p12 = pnand %p518_p11, %p514_p8 }
 0x202   : > { %522 = shalt.err (!%p519_p12)
}
 0x203   : > { %450 = dma.vmem_to_hbm [thread:$0]  (%p626_p5), %s328_s12, 128, %s700_s20, %s314_s22  }
 0x204 PF: > { %p456_p13 = scmp.ge.s32.totalorder %s557_s18, 2  ;;  %s339_s9 = sand.u32 1, %s545_s15  }
 0x205   : > { %s340_s10 = scalar_lea.sflag [#allocation3], %s339_s9 }
 0x206   : > { %p453_p0 = pnand %p456_p13, %p630_p6 }
 0x208   : > { %p454_p1 = pneg %p453_p0 }
 0x20a   : > { %540 = dma.done.wait (%p454_p1), %s340_s10, 128  }
 0x20b   : > { %542 = vsyncadd (%p454_p1), %s340_s10, 4294967168  ;;  %p14_p2 = scmp.ge.s32.totalorder %s613_s21, 4   ;;  %s742_s15 = smov %s549_s16 }
 0x20c   : > { %s743_s16 = smov %s553_s17  ;;  %s744_s17 = smov %s624_s24 }
 0x20d   : > { %s745_s18 = smov %s613_s21  ;;  %16 = sbr.rel (!%p14_p2) target bundleno = 3 (0x3), region = 71 }
 0x212   :  { %345 = vsyncpa [#allocation3], 1 }
 0x213   :  { %347 = vsyncpa [#allocation3 + $0x1], 1 }

</bundles_post_ra>
